<compile_context>
chip_gen: v7x
topology: tpu7x:2x2x1
jax: 0.10.0
libtpu: 0.0.40
codegen_flags: <defaults>
</compile_context>

<pallas_src>
import functools

import jax
import jax.numpy as jnp
from jax.experimental import pallas as pl
from jax.experimental.pallas import tpu as pltpu


def _bcl_tile_kernel(scores_ref, tgt_ref, r_t_ref, out_ref, *, n_total, tile_n):
    """One batch tile: fused log_softmax + in-kernel gathered-R reduce -> partial."""
    i = pl.program_id(0)

    x = scores_ref[...].astype(jnp.float32)                # (tile_n, C)
    tn, c = x.shape

    # One-hot of the per-tile targets, then gather the needed R column on the
    # MXU:  sel[r, :] = R[:, targets[r]] = R^T[targets[r], :].
    tgt = tgt_ref[...]                                      # (tile_n, 1) int32
    class_ids = jax.lax.broadcasted_iota(jnp.int32, (tn, c), 1)
    onehot = (class_ids == tgt).astype(jnp.float32)         # (tile_n, C)
    sel = jnp.dot(onehot, r_t_ref[...].astype(jnp.float32),
                  preferred_element_type=jnp.float32)       # (tile_n, C)

    # Numerically stable log_softmax, fused so log_p is never materialized:
    #   picked[r] = sum_c (z - lse)[r, c] * sel[r, c]
    #             = sum_c z*sel  -  lse[r] * sum_c sel
    m = jnp.max(x, axis=1, keepdims=True)                   # (tile_n, 1)
    z = x - m
    lse = jnp.log(jnp.sum(jnp.exp(z), axis=1, keepdims=True))
    picked = (jnp.sum(z * sel, axis=1, keepdims=True)
              - lse * jnp.sum(sel, axis=1, keepdims=True))  # (tile_n, 1)

    # Mask the tail rows of a partial last block.  OOB reads are unspecified
    # (possibly non-finite), so the mask is applied on `picked` with a select
    # (jnp.where does not propagate NaN/Inf from the unselected branch).
    row_ids = i * tile_n + jax.lax.broadcasted_iota(jnp.int32, (tn, 1), 0)
    picked = jnp.where(row_ids < n_total, picked, 0.0)

    # Lane-dense, (8,128)-aligned output tile -> unmasked full-width store.
    out_ref[...] = jnp.full((1, 8, 128), jnp.sum(picked), dtype=jnp.float32)


def _auto_tile_n(requested: int, n: int, c: int, itemsize: int) -> int:
    """Clamp tile_n so the double-buffered working set stays v5e/v6e/v7x-safe."""
    lanes_c = max(c, 128)
    # scores (x2 buffers) + lane-padded int32 targets (x2) + f32 intermediates.
    per_row = 2 * lanes_c * itemsize + 2 * 128 * 4 + 6 * lanes_c * 4
    budget = 40 << 20                     # conservative vs v7x's 64 MiB physical VMEM
    max_rows = max(8, budget // max(per_row, 1))
    t = min(requested, max_rows, max(8, -(-n // 8) * 8))
    return max(8, (t // 8) * 8)           # keep sublane packing clean


def _vmem_limit_bytes(tile_n: int, c: int, itemsize: int) -> int:
    lanes_c = max(c, 128)
    blocks = 2 * tile_n * lanes_c * itemsize      # scores, double-buffered
    blocks += 2 * tile_n * 128 * 4                # targets block (lane-padded int32)
    blocks += 2 * c * lanes_c * 4                 # resident R^T block
    interms = 6 * tile_n * lanes_c * 4            # onehot / sel / z / exp / products
    total = blocks + interms + 2 * 8 * 128 * 4 + (4 << 20)   # + headroom
    return int(min(max(total, 16 << 20), 60 << 20))


def backward_correction_loss(
    scores: jax.Array, targets: jax.Array, R: jax.Array, *, tile_n: int = 512
) -> jax.Array:
    """scores: (N, C) float, targets: (N,) int, R: (C, C) float -> scalar f32 loss."""
    n, c = scores.shape
    itemsize = jnp.dtype(scores.dtype).itemsize
    tile_n = _auto_tile_n(tile_n, n, c, itemsize)
    num_tiles = pl.cdiv(n, tile_n)

    # Tiny host-side prep only: R^T (so the in-kernel one-hot matmul selects a
    # column of R) and targets reshaped to a 2-D int32 column.
    r_t = jnp.transpose(R).astype(jnp.float32)              # (C, C)
    tgt2d = targets.astype(jnp.int32).reshape(n, 1)          # (N, 1)

    kernel = functools.partial(_bcl_tile_kernel, n_total=n, tile_n=tile_n)

    partials = pl.pallas_call(
        kernel,
        out_shape=jax.ShapeDtypeStruct((num_tiles, 8, 128), jnp.float32),
        grid_spec=pl.GridSpec(
            grid=(num_tiles,),
            in_specs=[
                # scores stream in their native dtype (bf16 halves HBM traffic).
                pl.BlockSpec((tile_n, c), lambda i: (i, 0)),
                pl.BlockSpec((tile_n, 1), lambda i: (i, 0)),   # targets
                pl.BlockSpec((c, c), lambda i: (0, 0)),        # R^T, resident
            ],
            out_specs=pl.BlockSpec((1, 8, 128), lambda i: (i, 0, 0)),
        ),
        compiler_params=pltpu.CompilerParams(
            dimension_semantics=("parallel",),
            vmem_limit_bytes=_vmem_limit_bytes(tile_n, c, itemsize),
        ),
    )(scores, tgt2d, r_t)

    # Every lane of a tile's (1, 8, 128) output tile holds the same partial sum;
    # finish the mean with the true N (masked tail rows contributed zero).
    return -jnp.sum(partials[:, 0, 0]) / jnp.float32(n)


def _reference(scores, targets, R):
    log_p = jax.nn.log_softmax(scores.astype(jnp.float32), axis=1)
    rlog_p = log_p @ R.astype(jnp.float32)
    return -jnp.mean(rlog_p[jnp.arange(scores.shape[0]), targets])


if __name__ == "__main__":
    key = jax.random.PRNGKey(0)
    k1, k2, k3 = jax.random.split(key, 3)

    # N deliberately NOT a multiple of tile_n so the partial-last-block masking
    # path is exercised (4 tiles of 64; the last tile has only 8 valid rows).
    N, C = 200, 16

    scores = jax.random.normal(k1, (N, C), dtype=jnp.float32)
    targets = jax.random.randint(k2, (N,), 0, C, dtype=jnp.int32)

    # Deterministic synthetic backward-correction matrix R, shape (C, C).
    R = (jnp.eye(C, dtype=jnp.float32) * 0.9
         + jax.random.uniform(k3, (C, C), dtype=jnp.float32) * 0.1)

    loss = backward_correction_loss(scores, targets, R, tile_n=64)
    jax.block_until_ready(loss)

    ref = _reference(scores, targets, R)
    assert jnp.allclose(loss, ref, atol=1e-4, rtol=1e-4), (loss, ref)

    print("KERNEL_OK")
</pallas_src>

<mosaic_0001>
module attributes {stable_mosaic.version = 11 : i64} {
  func.func @_bcl_tile_kernel(%arg0: i32, %arg1: memref<64x16xf32, #tpu.memory_space<vmem>>, %arg2: memref<64x1xi32, #tpu.memory_space<vmem>>, %arg3: memref<16x16xf32, #tpu.memory_space<vmem>>, %arg4: memref<1x8x128xf32, #tpu.memory_space<vmem>>) attributes {dimension_semantics = [#tpu.dimension_semantics<parallel>], iteration_bounds = array<i64: 4>, scalar_prefetch = 0 : i64, scratch_operands = 0 : i64, tpu.core_type = #tpu.core_type<tc>, window_params = [{transform_indices = @transform_0, window_bounds = array<i64: 64, 16>}, {transform_indices = @transform_1, window_bounds = array<i64: 64, 1>}, {pipeline_mode = #tpu.pipeline_mode<synchronous>, transform_indices = @transform_2, window_bounds = array<i64: 16, 16>}, {transform_indices = @transform_3, window_bounds = array<i64: 1, 8, 128>}]} {
    %c0 = arith.constant 0 : index
    %c0_0 = arith.constant 0 : index
    %0 = vector.load %arg1[%c0, %c0_0] : memref<64x16xf32, #tpu.memory_space<vmem>>, vector<64x16xf32>
    %c0_1 = arith.constant 0 : index
    %c0_2 = arith.constant 0 : index
    %1 = vector.load %arg2[%c0_1, %c0_2] : memref<64x1xi32, #tpu.memory_space<vmem>>, vector<64x1xi32>
    %2 = tpu.iota {dimensions = array<i32: 1>} : vector<64x16xi32>
    %3 = vector.broadcast %1 : vector<64x1xi32> to vector<64x16xi32>
    %4 = arith.cmpi eq, %2, %3 : vector<64x16xi32>
    %5 = arith.extui %4 : vector<64x16xi1> to vector<64x16xi32>
    %6 = arith.sitofp %5 : vector<64x16xi32> to vector<64x16xf32>
    %c0_3 = arith.constant 0 : index
    %c0_4 = arith.constant 0 : index
    %7 = vector.load %arg3[%c0_3, %c0_4] : memref<16x16xf32, #tpu.memory_space<vmem>>, vector<16x16xf32>
    %cst = arith.constant dense<0.000000e+00> : vector<64x16xf32>
    %8 = tpu.matmul %6, %7, %cst {dimension_numbers = #tpu.dot_dimension_numbers<[1], [0], [0], [1], [0, 0, 1, 1], [], []>} : vector<64x16xf32>, vector<16x16xf32>, vector<64x16xf32> -> vector<64x16xf32>
    %cst_5 = arith.constant dense<0xFF800000> : vector<64xf32>
    %9 = vector.multi_reduction <maximumf>, %0, %cst_5 [1] : vector<64x16xf32> to vector<64xf32>
    %10 = vector.shape_cast %9 : vector<64xf32> to vector<64x1xf32>
    %11 = vector.broadcast %10 : vector<64x1xf32> to vector<64x16xf32>
    %12 = arith.subf %0, %11 : vector<64x16xf32>
    %13 = math.exp %12 : vector<64x16xf32>
    %cst_6 = arith.constant dense<0.000000e+00> : vector<64xf32>
    %14 = vector.multi_reduction <add>, %13, %cst_6 [1] : vector<64x16xf32> to vector<64xf32>
    %15 = vector.shape_cast %14 : vector<64xf32> to vector<64x1xf32>
    %16 = math.log %15 : vector<64x1xf32>
    %17 = arith.mulf %12, %8 : vector<64x16xf32>
    %cst_7 = arith.constant dense<0.000000e+00> : vector<64xf32>
    %18 = vector.multi_reduction <add>, %17, %cst_7 [1] : vector<64x16xf32> to vector<64xf32>
    %19 = vector.shape_cast %18 : vector<64xf32> to vector<64x1xf32>
    %cst_8 = arith.constant dense<0.000000e+00> : vector<64xf32>
    %20 = vector.multi_reduction <add>, %8, %cst_8 [1] : vector<64x16xf32> to vector<64xf32>
    %21 = vector.shape_cast %20 : vector<64xf32> to vector<64x1xf32>
    %22 = arith.mulf %16, %21 : vector<64x1xf32>
    %23 = arith.subf %19, %22 : vector<64x1xf32>
    %c64_i32 = arith.constant 64 : i32
    %24 = arith.muli %arg0, %c64_i32 : i32
    %25 = tpu.iota {dimensions = array<i32: 0>} : vector<64x1xi32>
    %26 = vector.broadcast %24 : i32 to vector<64x1xi32>
    %27 = arith.addi %26, %25 : vector<64x1xi32>
    %c200_i32 = arith.constant 200 : i32
    %28 = vector.broadcast %c200_i32 : i32 to vector<64x1xi32>
    %29 = arith.cmpi slt, %27, %28 : vector<64x1xi32>
    %cst_9 = arith.constant 0.000000e+00 : f32
    %30 = vector.broadcast %cst_9 : f32 to vector<64x1xf32>
    %31 = arith.select %29, %23, %30 : vector<64x1xi1>, vector<64x1xf32>
    %32 = vector.shape_cast %31 : vector<64x1xf32> to vector<1x64x1xf32>
    %cst_10 = arith.constant dense<0.000000e+00> : vector<1xf32>
    %33 = vector.multi_reduction <add>, %32, %cst_10 [1, 2] : vector<1x64x1xf32> to vector<1xf32>
    %34 = vector.shape_cast %33 : vector<1xf32> to vector<1x1x1xf32>
    %35 = vector.extract %34[0, 0, 0] : f32 from vector<1x1x1xf32>
    %36 = vector.broadcast %35 : f32 to vector<1x8x128xf32>
    %c0_11 = arith.constant 0 : index
    %c0_12 = arith.constant 0 : index
    %c0_13 = arith.constant 0 : index
    %37 = vector.load %arg4[%c0_11, %c0_12, %c0_13] : memref<1x8x128xf32, #tpu.memory_space<vmem>>, vector<1x8x128xf32>
    tpu.vector_store %arg4[%c0_11, %c0_12, %c0_13], %36 {strides = array<i32>} : memref<1x8x128xf32, #tpu.memory_space<vmem>>, vector<1x8x128xf32>,
    return
  }
  func.func @transform_0(%arg0: i32) -> (i32, i32) {
    %c0_i32 = arith.constant 0 : i32
    %c0_i32_0 = arith.constant 0 : i32
    return %arg0, %c0_i32 : i32, i32
  }
  func.func @transform_1(%arg0: i32) -> (i32, i32) {
    %c0_i32 = arith.constant 0 : i32
    %c0_i32_0 = arith.constant 0 : i32
    return %arg0, %c0_i32 : i32, i32
  }
  func.func @transform_2(%arg0: i32) -> (i32, i32) {
    %c0_i32 = arith.constant 0 : i32
    %c0_i32_0 = arith.constant 0 : i32
    %c0_i32_1 = arith.constant 0 : i32
    return %c0_i32, %c0_i32_0 : i32, i32
  }
  func.func @transform_3(%arg0: i32) -> (i32, i32, i32) {
    %c0_i32 = arith.constant 0 : i32
    %c0_i32_0 = arith.constant 0 : i32
    %c0_i32_1 = arith.constant 0 : i32
    return %arg0, %c0_i32, %c0_i32_0 : i32, i32, i32
  }
}

</mosaic_0001>

<bundles_post_ra>
// kernel: tpu_custom_call.1
= control target key start
LH: loop header
LB: loop body
LE: loop exit
PB: predicated region body
PF: predicated region fallthrough
CT: control target
= control target key end

     0   :  { %8 = vsyncpa [#allocation3], 0  ;;  %s1192_s0 = inlined_call_operand.vmem [shape: f32[200,16], index: 0, kind: input, shape index: {}]   ;;  %s1193_s1 = inlined_call_operand.vmem [shape: s32[200,1], index: 1, kind: input, shape index: {}]   ;;  %s1194_s2 = inlined_call_operand.vmem [shape: f32[16,16], index: 2, kind: input, shape index: {}]   ;;  %s1195_s3 = inlined_call_operand.hbm [shape: f32[4,8,128], index: 3, kind: output, shape index: {}]  }
   0x1   :  { %10 = vsyncpa [#allocation3 + $0x1], 0  ;;  %s964_s12 = smov 0   ;;  %s966_s13 = smov 0  }
   0x2   :  { %s968_s14 = smov 0   ;;  %s970_s15 = smov 0  }
   0x3 LB: > { %s985_s16 = sadd.s32 4294967295, %s939_s15   ;;  %s738_s17 = sadd.s32 4294967294, %s939_s15   ;;  %s939_s15 = sphi %s970_s15, %s1201_s15   ;;  %s935_s14 = sphi %s968_s14, %s1200_s14   ;;  %s931_s13 = sphi %s966_s13, %s1199_s13   ;;  %s927_s12 = sphi %s964_s12, %s1198_s12  }
   0x4   : > { %s989_s18 = sadd.s32 1, %s939_s15   ;;  %s96_s19 = sadd.s32 1, %s935_s14 }
   0x5   : > { %s93_s20 = ssub.s32 %s939_s15, %s989_s18  ;;  %p106_p0 = scmp.ne.s32.totalorder %s935_s14, %s931_s13 }
   0x6   : > { %p94_p1 = scmp.eq.s32.totalorder %s93_s20, 0  ;;  %p107_p2 = scmp.eq.s32.totalorder %s985_s16, 3 }
   0x7   : > { %p112_p3 = scmp.ne.s32.totalorder %s931_s13, %s927_s12  ;;  %p113_p4 = scmp.eq.s32.totalorder %s738_s17, 3 }
   0x8   : > { %s1000_s21 = scalar_select %p94_p1, %s935_s14, %s96_s19  }
   0x9   : > { %p1002_p5 = por %p107_p2, %p106_p0  ;;  %p1006_p6 = por %p113_p4, %p112_p3 }
   0xa   : > { %p741_p7 = scmp.ge.s32.totalorder %s939_s15, 1  ;;  %p168_p8 = scmp.lt.s32.totalorder %s939_s15, 5 }
   0xc   : > { %p169_p9 = pnand %p741_p7, %p168_p8 }
   0xd   : > { %s743_s24 = sshll.u32 (!%p169_p9), %s985_s16, 3  ;;  %v941_v0 = vmov (!%p169_p9), 0   ;;  %v299_v5 = vld [vmem:[%s1194_s2] sm:$0xff] (!%p169_p9)  ;;  %v300_v6 = vld [vmem:[%s1194_s2 + $0x8] sm:$0xff] (!%p169_p9)  ;;  %vm301_vm0 = vcmask (!%p169_p9), 130048   ;;  %v249_v28 = vlaneseq (!%p169_p9)  ;;  %v942_v32 = vmov (!%p169_p9), 0.0  }
   0xe   : > { %172 = sbr.rel (%p169_p9) target bundleno = 771 (0x303), region = 32  ;;  %844 = vset.pattern.permute.xlu1 (!%p169_p9), %v941_v0  ;;  %843 = vset.pattern.permute.xlu0 (!%p169_p9), %v941_v0  ;;  %p210_p10 = scmp.lt.s32.totalorder (!%p169_p9), %s743_s24, 24  ;;  %v794_v7 = vpack.c.bf16 (!%p169_p9), %v300_v6, %v299_v5  ;;  %vm626_vm11 = vcmask (!%p169_p9), 7168  }
   0xf   : > { %v250_v29 = vand.u32 (!%p169_p9), 127, %v249_v28  ;;  %s763_s9 = sshll.u32 (!%p169_p9), %s985_s16, 6  ;;  %s202_s10 = sand.u32 (!%p169_p9), 1, %s931_s13  }
  0x10   : > { %795 = vmatprep.subr.bf16.mxu0 (!%p169_p9), %v794_v7  ;;  %798 = vmatprep.subr.bf16.mxu1 (!%p169_p9), %v794_v7  ;;  %s742_s11 = sshll.u32 (!%p169_p9), %s202_s10, 3  ;;  %s765_s20 = sshll.u32 (!%p169_p9), %s985_s16, 7 }
  0x11   : > { %797 = vmatpush3.bf16.msra.mxu0 (!%p169_p9), %v794_v7  ;;  %799 = vmatpush3.bf16.msra.mxu1 (!%p169_p9), %v794_v7  ;;  %s204_s17 = scalar_lea.vmem (!%p169_p9), [#allocation2], %s742_s11  ;;  %s1152_s27 = scalar_lea.hbm (!%p169_p9), %s1195_s3, %s765_s20 }
  0x12   : > { %s667_s19 = sshll.u32 (!%p169_p9), %s204_s17, 4  ;;  %s943_s16 = smov (!%p169_p9), [#allocation2]   ;;  %s1147_s19 = int_to_ptr.vmem [resolvable:$true] %s667_s19 }
  0x13   : > { %s877_s29 = scalar_lea.vmem (!%p169_p9), %s1147_s19, 128  ;;  %s881_s30 = sshll.u32 (!%p169_p9), %s943_s16, 4  ;;  %s882_s30 = int_to_ptr.vmem [resolvable:$false] %s881_s30 }
  0x14   : > { %p878_p11 = scmp.ne.s32.totalorder (!%p169_p9), %s1147_s19, %s877_s29  ;;  %s883_s4 = scalar_lea.vmem (!%p169_p9), %s882_s30, 256 }
  0x15   : > { %s1203_s24 = smov (!%p210_p10, %s743_s24), 24  ;;  %p884_p0 = scmp.lt.s32.totalorder %s1147_s19, %s882_s30 }
  0x16   : > { %s744_s25 = sshll.u32 %s1203_s24, 3  ;;  %p879_p12 = pnand %p878_p11, %p1002_p5 }
  0x17   : > { %s227_s28 = scalar_lea.vmem %s1193_s1, %s744_s25  ;;  %s213_s8 = scalar_lea.vmem %s1192_s0, %s744_s25 }
  0x18   : > { %v243_v1 = vld [vmem:[%s227_s28 + $0x10] sm:$0xff]  ;;  %v241_v2 = vld [vmem:[%s227_s28] sm:$0xff]  ;;  %v244_v3 = vld [vmem:[%s227_s28 + $0x18] sm:$0xff]  ;;  %p880_p13 = pneg %p879_p12  ;;  %p885_p1 = scmp.lt.s32.totalorder %s883_s4, %s877_s29 }
  0x19   : > { %258 = vperm.xlu1 %844, %v243_v1   ;;  %252 = vperm.xlu0 %843, %v241_v2   ;;  %v242_v4 = vld [vmem:[%s227_s28 + $0x8] sm:$0xff]  ;;  %v245_v9 = vld [vmem:[%s227_s28 + $0x20] sm:$0xff]  ;;  %v248_v10 = vld [vmem:[%s227_s28 + $0x38] sm:$0xff] }
  0x1a   : > { %v246_v8 = vld [vmem:[%s227_s28 + $0x28] sm:$0xff]  ;;  %v247_v11 = vld [vmem:[%s227_s28 + $0x30] sm:$0xff]  ;;  %v233_v12 = vld [vmem:[%s213_s8] sm:$0xff]  ;;  %s654_s28 = scalar_lea.sflag [#allocation3], %s202_s10  ;;  %p886_p2 = por %p885_p1, %p884_p0 }
  0x1b   : > { %v431_v13 = vsel %vm301_vm0, %v233_v12, -inf  ;;  %v1026_v14 = vld [vmem:[%s213_s8 + $0x10] sm:$0xff]  ;;  %v1028_v15 = vld [vmem:[%s213_s8 + $0x8] sm:$0xff]  ;;  %v1034_v18 = vld [vmem:[%s213_s8 + $0x18] sm:$0xff] }
  0x1c   : > { %v437_v16 = vsel %vm301_vm0, %v1026_v14, -inf  ;;  %v434_v17 = vsel %vm301_vm0, %v1028_v15, -inf  ;;  %v1036_v19 = vld [vmem:[%s213_s8 + $0x20] sm:$0xff]  ;;  %v440_v20 = vsel %vm301_vm0, %v1034_v18, -inf  ;;  %v1040_v21 = vld [vmem:[%s213_s8 + $0x28] sm:$0xff]  ;;  %v1044_v23 = vld [vmem:[%s213_s8 + $0x30] sm:$0xff]  ;;  %p887_p3 = pnand %p886_p2, %p880_p13 }
  0x1d   : > { %261 = vperm.xlu1 %844, %v244_v3   ;;  %255 = vperm.xlu0 %843, %v242_v4   ;;  %v443_v22 = vsel %vm301_vm0, %v1036_v19, -inf  ;;  %v446_v24 = vsel %vm301_vm0, %v1040_v21, -inf  ;;  %v1048_v25 = vld [vmem:[%s213_s8 + $0x38] sm:$0xff]  ;;  %v449_v26 = vsel %vm301_vm0, %v1044_v23, -inf }
  0x1e   : > { %v452_v27 = vsel %vm301_vm0, %v1048_v25, -inf }
  0x21   : > { %267 = vperm.xlu1 %844, %v246_v8   ;;  %264 = vperm.xlu0 %843, %v245_v9  }
  0x25   : > { %273 = vperm.xlu1 %844, %v248_v10   ;;  %270 = vperm.xlu0 %843, %v247_v11  }
  0x44   : > { %432 = vmax.xlane.f32.xlu0 %v431_v13 }
  0x48   : > { %438 = vmax.xlane.f32.xlu0 %v437_v16 }
  0x49   : > { %435 = vmax.xlane.f32.xlu1 %v434_v17 }
  0x4c   : > { %441 = vmax.xlane.f32.xlu0 %v440_v20 }
  0x4d   : > { %444 = vmax.xlane.f32.xlu1 %v443_v22 }
  0x50   : > { %447 = vmax.xlane.f32.xlu0 %v446_v24 }
  0x51   : > { %450 = vmax.xlane.f32.xlu1 %v449_v26 }
  0x54   : > { %453 = vmax.xlane.f32.xlu0 %v452_v27 }
  0x98   : > { %v259_v30 = vpop.permute.xlu1 %258  ;;  %v253_v31 = vpop.permute.xlu0 %252 }
  0x99   : > { %vm275_vm1 = vcmp.eq.s32.totalorder %v250_v29, %v253_v31  ;;  %vm277_vm2 = vcmp.eq.s32.totalorder %v250_v29, %v259_v30 }
  0x9a   : > { %v747_v33 = vsel %vm275_vm1, 1.0, %v942_v32  ;;  %v749_v37 = vsel %vm277_vm2, 1.0, %v942_v32 }
  0x9b   : > { %782 = vmatprep.mubr.msk.f32.mxu0 %vm301_vm0, %v747_v33 }
  0x9c   : > { %v262_v34 = vpop.permute.xlu1 %261  ;;  %v256_v35 = vpop.permute.xlu0 %255 }
  0x9d   : > { %vm276_vm3 = vcmp.eq.s32.totalorder %v250_v29, %v256_v35  ;;  %vm278_vm4 = vcmp.eq.s32.totalorder %v250_v29, %v262_v34 }
  0x9e   : > { %v748_v36 = vsel %vm276_vm3, 1.0, %v942_v32  ;;  %v750_v40 = vsel %vm278_vm4, 1.0, %v942_v32 }
  0x9f   : > { %783 = vmatmul.mubr.msk.f32.vlgmr.msra.gmra.mrb[0].mxu0 %vm301_vm0, %v748_v36 }
  0xa0   : > { %v268_v38 = vpop.permute.xlu1 %267  ;;  %785 = vmatprep.mubr.msk.f32.mxu0 %vm301_vm0, %v749_v37  ;;  %v265_v39 = vpop.permute.xlu0 %264 }
  0xa1   : > { %vm280_vm5 = vcmp.eq.s32.totalorder %v250_v29, %v268_v38  ;;  %vm279_vm6 = vcmp.eq.s32.totalorder %v250_v29, %v265_v39 }
  0xa2   : > { %v752_v41 = vsel %vm280_vm5, 1.0, %v942_v32  ;;  %v751_v42 = vsel %vm279_vm6, 1.0, %v942_v32 }
  0xa3   : > { %786 = vmatmul.mubr.msk.f32.gmra.mrb[2].mxu0 %vm301_vm0, %v750_v40  ;;  %788 = vmatprep.mubr.msk.f32.mxu1 %vm301_vm0, %v751_v42 }
  0xa4   : > { %v274_v43 = vpop.permute.xlu1 %273  ;;  %789 = vmatmul.mubr.msk.f32.vlgmr.msra.gmra.mrb[0].mxu1 %vm301_vm0, %v752_v41  ;;  %v271_v44 = vpop.permute.xlu0 %270 }
  0xa5   : > { %vm282_vm7 = vcmp.eq.s32.totalorder %v250_v29, %v274_v43  ;;  %vm281_vm8 = vcmp.eq.s32.totalorder %v250_v29, %v271_v44 }
  0xa6   : > { %v754_v45 = vsel %vm282_vm7, 1.0, %v942_v32  ;;  %v753_v46 = vsel %vm281_vm8, 1.0, %v942_v32 }
  0xa7   : > { %791 = vmatprep.mubr.msk.f32.mxu1 %vm301_vm0, %v753_v46 }
  0xa8   : > { %792 = vmatmul.mubr.msk.f32.gmra.mrb[2].mxu1 %vm301_vm0, %v754_v45 }
  0xd1   : > { %v433_v47 = vpop.xlane.xlu0 %432 }
  0xd2   : > { %v1063_v48 = vsub.f32 %v233_v12, %v433_v47 }
  0xd4   : > { %v463_v49 = vmul.f32 1.442695, %v1063_v48 }
  0xd5   : > { %v439_v50 = vpop.xlane.xlu0 %438 }
  0xd6   : > { %845 = vpow2.f32 %v463_v49  ;;  %v436_v51 = vpop.xlane.xlu1 %435  ;;  %v1067_v52 = vsub.f32 %v1026_v14, %v439_v50 }
  0xd7   : > { %v456_v53 = vsub.f32 %v1028_v15, %v436_v51 }
  0xd8   : > { %v467_v54 = vmul.f32 1.442695, %v1067_v52 }
  0xd9   : > { %v465_v55 = vmul.f32 1.442695, %v456_v53  ;;  %v442_v56 = vpop.xlane.xlu0 %441 }
  0xda   : > { %847 = vpow2.f32 %v467_v54  ;;  %v458_v57 = vsub.f32 %v1034_v18, %v442_v56  ;;  %v445_v58 = vpop.xlane.xlu1 %444 }
  0xdb   : > { %849 = vpow2.f32 %v465_v55  ;;  %v459_v59 = vsub.f32 %v1036_v19, %v445_v58 }
  0xdc   : > { %v469_v60 = vmul.f32 1.442695, %v458_v57 }
  0xdd   : > { %v448_v61 = vpop.xlane.xlu0 %447  ;;  %v471_v62 = vmul.f32 1.442695, %v459_v59 }
  0xde   : > { %851 = vpow2.f32 %v469_v60  ;;  %v1074_v63 = vsub.f32 %v1040_v21, %v448_v61  ;;  %v451_v0 = vpop.xlane.xlu1 %450 }
  0xdf   : > { %853 = vpow2.f32 %v471_v62  ;;  %v1077_v1 = vsub.f32 %v1044_v23, %v451_v0 }
  0xe0   : > { %v846_v2 = vpop.eup %845  ;;  %v473_v3 = vmul.f32 1.442695, %v1074_v63 }
  0xe1   : > { %v454_v4 = vpop.xlane.xlu0 %453  ;;  %v475_v5 = vmul.f32 1.442695, %v1077_v1  ;;  %v479_v6 = vsel %vm301_vm0, %v846_v2, 0.0  ;;  %v1115_v2 = vshrl.u32 %v249_v28, 7 }
  0xe2   : > { %855 = vpow2.f32 %v473_v3  ;;  %v1083_v7 = vsub.f32 %v1048_v25, %v454_v4  ;;  %480 = vadd.xlane.f32.xlu1 %v479_v6 }
  0xe3   : > { %857 = vpow2.f32 %v475_v5 }
  0xe4   : > { %v848_v8 = vpop.eup %847  ;;  %v477_v9 = vmul.f32 1.442695, %v1083_v7 }
  0xe5   : > { %v850_v10 = vpop.eup %849  ;;  %v485_v11 = vsel %vm301_vm0, %v848_v8, 0.0 }
  0xe6   : > { %859 = vpow2.f32 %v477_v9  ;;  %v482_v12 = vsel %vm301_vm0, %v850_v10, 0.0  ;;  %486 = vadd.xlane.f32.xlu1 %v485_v11 }
  0xe7   : > { %483 = vadd.xlane.f32.xlu0 %v482_v12  ;;  %v1119_v12 = vstv %s763_s9 }
  0xe8   : > { %v852_v13 = vpop.eup %851  ;;  %v602_v28 = vadd.s32 %v1119_v12, %v1115_v2 }
  0xe9   : > { %v854_v14 = vpop.eup %853  ;;  %v488_v15 = vsel %vm301_vm0, %v852_v13, 0.0 }
  0xea   : > { %v491_v16 = vsel %vm301_vm0, %v854_v14, 0.0  ;;  %vm610_vm9 = vcmp.lt.s32.totalorder %v602_v28, 200 }
  0xeb   : > { %489 = vadd.xlane.f32.xlu0 %v488_v15  ;;  %492 = vadd.xlane.f32.xlu1 %v491_v16  ;;  %v596_v16 = vadd.s32 24, %v1115_v2 }
  0xec   : > { %v856_v17 = vpop.eup %855 }
  0xed   : > { %v858_v18 = vpop.eup %857  ;;  %v494_v19 = vsel %vm301_vm0, %v856_v17, 0.0 }
  0xee   : > { %v497_v20 = vsel %vm301_vm0, %v858_v18, 0.0 }
  0xef   : > { %495 = vadd.xlane.f32.xlu0 %v494_v19  ;;  %498 = vadd.xlane.f32.xlu1 %v497_v20  ;;  %v595_v19 = vadd.s32 16, %v1115_v2 }
  0xf0   : > { %v860_v21 = vpop.eup %859 }
  0xf1   : > { %v500_v22 = vsel %vm301_vm0, %v860_v21, 0.0 }
  0xf3   : > { %501 = vadd.xlane.f32.xlu0 %v500_v22 }
 0x172   : > { %v784_v23 = vpop.f32.mrb[0].mxu0 }
 0x173   : > { %v520_v24 = vmul.f32 %v784_v23, %v456_v53  ;;  %v392_v25 = vpop.f32.mrb[1].mxu0  ;;  %v554_v26 = vsel %vm301_vm0, %v784_v23, 0.0 }
 0x174   : > { %555 = vadd.xlane.f32.xlu0 %v554_v26  ;;  %v551_v27 = vsel %vm301_vm0, %v392_v25, 0.0  ;;  %v519_v34 = vmul.f32 %v1063_v48, %v392_v25  ;;  %v484_v56 = vpop.xlane.xlu0 %483  ;;  %v597_v25 = vadd.s32 32, %v1115_v2 }
 0x175   : > { %552 = vadd.xlane.f32.xlu1 %v551_v27  ;;  %v530_v32 = vsel %vm301_vm0, %v520_v24, 0.0 }
 0x176   : > { %v787_v29 = vpop.f32.mrb[2].mxu0  ;;  %v527_v41 = vsel %vm301_vm0, %v519_v34, 0.0 }
 0x177   : > { %v402_v30 = vpop.f32.mrb[3].mxu0  ;;  %v790_v31 = vpop.f32.mrb[0].mxu1  ;;  %v522_v37 = vmul.f32 %v787_v29, %v458_v57  ;;  %v560_v44 = vsel %vm301_vm0, %v787_v29, 0.0  ;;  %v605_v29 = vadd.s32 %v1119_v12, %v596_v16 }
 0x178   : > { %v412_v33 = vpop.f32.mrb[1].mxu1  ;;  %531 = vadd.xlane.f32.xlu0 %v530_v32  ;;  %v521_v42 = vmul.f32 %v1067_v52, %v402_v30  ;;  %v524_v45 = vmul.f32 %v790_v31, %v1074_v63  ;;  %v557_v47 = vsel %vm301_vm0, %v402_v30, 0.0  ;;  %v566_v50 = vsel %vm301_vm0, %v790_v31, 0.0  ;;  %v481_v57 = vpop.xlane.xlu1 %480 }
 0x179   : > { %v523_v35 = vmul.f32 %v459_v59, %v412_v33  ;;  %v563_v36 = vsel %vm301_vm0, %v412_v33, 0.0  ;;  %v536_v43 = vsel %vm301_vm0, %v522_v37, 0.0  ;;  %v490_v58 = vpop.xlane.xlu0 %489  ;;  %861 = vlog2.f32 %v481_v57 }
 0x17a   : > { %564 = vadd.xlane.f32.xlu1 %v563_v36  ;;  %v533_v46 = vsel %vm301_vm0, %v521_v42, 0.0  ;;  %v542_v49 = vsel %vm301_vm0, %v524_v45, 0.0  ;;  %863 = vlog2.f32 %v484_v56  ;;  %v604_v32 = vadd.s32 %v1119_v12, %v595_v19 }
 0x17b   : > { %v793_v38 = vpop.f32.mrb[2].mxu1  ;;  %v539_v39 = vsel %vm301_vm0, %v523_v35, 0.0  ;;  %865 = vlog2.f32 %v490_v58  ;;  %v598_v33 = vadd.s32 40, %v1115_v2  ;;  %vm613_vm12 = vcmp.lt.s32.totalorder %v605_v29, 200 }
 0x17c   : > { %v422_v40 = vpop.f32.mrb[3].mxu1  ;;  %540 = vadd.xlane.f32.xlu0 %v539_v39  ;;  %v526_v51 = vmul.f32 %v793_v38, %v1083_v7  ;;  %v572_v55 = vsel %vm301_vm0, %v793_v38, 0.0  ;;  %v487_v59 = vpop.xlane.xlu1 %486  ;;  %v594_v7 = vadd.s32 8, %v1115_v2  ;;  %v606_v38 = vadd.s32 %v1119_v12, %v597_v25 }
 0x17d   : > { %v525_v48 = vmul.f32 %v1077_v1, %v422_v40  ;;  %v569_v53 = vsel %vm301_vm0, %v422_v40, 0.0  ;;  %v496_v60 = vpop.xlane.xlu0 %495  ;;  %vm612_vm13 = vcmp.lt.s32.totalorder %v604_v32, 200  ;;  %v607_v45 = vadd.s32 %v1119_v12, %v598_v33 }
 0x17e   : > { %528 = vadd.xlane.f32.xlu1 %v527_v41  ;;  %v548_v54 = vsel %vm301_vm0, %v526_v51, 0.0  ;;  %v603_v17 = vadd.s32 %v1119_v12, %v594_v7  ;;  %vm614_vm14 = vcmp.lt.s32.totalorder %v606_v38, 200 }
 0x17f   : > { %v545_v52 = vsel %vm301_vm0, %v525_v48, 0.0  ;;  %vm615_vm15 = vcmp.lt.s32.totalorder %v607_v45, 200 }
 0x180   : > { %537 = vadd.xlane.f32.xlu0 %v536_v43  ;;  %v493_v61 = vpop.xlane.xlu1 %492  ;;  %vm611_vm10 = vcmp.lt.s32.totalorder %v603_v17, 200 }
 0x181   : > { %v502_v62 = vpop.xlane.xlu0 %501  ;;  %867 = vlog2.f32 %v493_v61 }
 0x182   : > { %561 = vadd.xlane.f32.xlu1 %v560_v44  ;;  %869 = vlog2.f32 %v487_v59  ;;  %v600_v59 = vadd.s32 56, %v1115_v2 }
 0x183   : > { %v862_v4 = vpop.eup %861  ;;  %871 = vlog2.f32 %v496_v60 }
 0x184   : > { %534 = vadd.xlane.f32.xlu0 %v533_v46  ;;  %v499_v63 = vpop.xlane.xlu1 %498  ;;  %v864_v5 = vpop.eup %863  ;;  %v504_v11 = vmul.f32 0.6931472, %v862_v4  ;;  %v599_v46 = vadd.s32 48, %v1115_v2 }
 0x185   : > { %v866_v9 = vpop.eup %865  ;;  %v506_v10 = vmul.f32 0.6931472, %v864_v5  ;;  %873 = vlog2.f32 %v499_v63 }
 0x186   : > { %558 = vadd.xlane.f32.xlu1 %v557_v47  ;;  %v510_v23 = vmul.f32 0.6931472, %v866_v9  ;;  %875 = vlog2.f32 %v502_v62  ;;  %v608_v58 = vadd.s32 %v1119_v12, %v599_v46  ;;  %v609_v9 = vadd.s32 %v1119_v12, %v600_v59 }
 0x188   : > { %543 = vadd.xlane.f32.xlu0 %v542_v49  ;;  %vm616_vm0 = vcmp.lt.s32.totalorder %v608_v58, 200  ;;  %vm617_vm1 = vcmp.lt.s32.totalorder %v609_v9, 200 }
 0x18a   : > { %567 = vadd.xlane.f32.xlu1 %v566_v50 }
 0x18b   : > { %v868_v13 = vpop.eup %867 }
 0x18c   : > { %546 = vadd.xlane.f32.xlu0 %v545_v52  ;;  %v512_v21 = vmul.f32 0.6931472, %v868_v13  ;;  %v870_v24 = vpop.eup %869 }
 0x18d   : > { %v508_v36 = vmul.f32 0.6931472, %v870_v24  ;;  %v872_v37 = vpop.eup %871 }
 0x18e   : > { %570 = vadd.xlane.f32.xlu1 %v569_v53  ;;  %v514_v49 = vmul.f32 0.6931472, %v872_v37 }
 0x18f   : > { %v874_v50 = vpop.eup %873 }
 0x190   : > { %549 = vadd.xlane.f32.xlu0 %v548_v54  ;;  %v516_v63 = vmul.f32 0.6931472, %v874_v50 }
 0x192   : > { %573 = vadd.xlane.f32.xlu1 %v572_v55 }
 0x201   : > { %v556_v0 = vpop.xlane.xlu0 %555 }
 0x202   : > { %v553_v1 = vpop.xlane.xlu1 %552  ;;  %v576_v20 = vmul.f32 %v556_v0, %v506_v10  ;;  %v876_v0 = vpop.eup %875 }
 0x203   : > { %v575_v15 = vmul.f32 %v553_v1, %v504_v11  ;;  %v518_v11 = vmul.f32 0.6931472, %v876_v0 }
 0x205   : > { %v532_v3 = vpop.xlane.xlu0 %531 }
 0x206   : > { %v584_v27 = vsub.f32 %v532_v3, %v576_v20 }
 0x207   : > { %v565_v6 = vpop.xlane.xlu1 %564 }
 0x208   : > { %v579_v34 = vmul.f32 %v565_v6, %v512_v21  ;;  %v619_v40 = vsel %vm611_vm10, %v584_v27, 0.0 }
 0x209   : > { %v541_v8 = vpop.xlane.xlu0 %540  ;;  %v628_v51 = vsel %vm626_vm11, %v619_v40, 0.0 }
 0x20a   : > { %v587_v47 = vsub.f32 %v541_v8, %v579_v34 }
 0x20b   : > { %v529_v14 = vpop.xlane.xlu1 %528 }
 0x20c   : > { %v583_v22 = vsub.f32 %v529_v14, %v575_v15  ;;  %v622_v60 = vsel %vm614_vm14, %v587_v47, 0.0 }
 0x20d   : > { %v538_v18 = vpop.xlane.xlu0 %537  ;;  %v634_v8 = vsel %vm626_vm11, %v622_v60, 0.0 }
 0x20e   : > { %v618_v35 = vsel %vm610_vm9, %v583_v22, 0.0 }
 0x20f   : > { %v562_v26 = vpop.xlane.xlu1 %561  ;;  %v627_v43 = vsel %vm626_vm11, %v618_v35, 0.0 }
 0x210   : > { %v578_v30 = vmul.f32 %v562_v26, %v510_v23  ;;  %v629_v53 = vadd.f32 %v628_v51, %v627_v43 }
 0x211   : > { %v535_v31 = vpop.xlane.xlu0 %534 }
 0x212   : > { %v586_v41 = vsub.f32 %v538_v18, %v578_v30 }
 0x213   : > { %v559_v39 = vpop.xlane.xlu1 %558 }
 0x214   : > { %v577_v42 = vmul.f32 %v559_v39, %v508_v36  ;;  %v621_v54 = vsel %vm613_vm12, %v586_v41, 0.0 }
 0x215   : > { %v544_v44 = vpop.xlane.xlu0 %543  ;;  %v632_v1 = vsel %vm626_vm11, %v621_v54, 0.0 }
 0x216   : > { %v585_v48 = vsub.f32 %v535_v31, %v577_v42 }
 0x217   : > { %v568_v52 = vpop.xlane.xlu1 %567 }
 0x218   : > { %v620_v55 = vsel %vm612_vm13, %v585_v48, 0.0  ;;  %v580_v56 = vmul.f32 %v568_v52, %v514_v49 }
 0x219   : > { %v630_v57 = vsel %vm626_vm11, %v620_v55, 0.0  ;;  %v547_v3 = vpop.xlane.xlu0 %546 }
 0x21a   : > { %v631_v61 = vadd.f32 %v630_v57, %v629_v53  ;;  %v588_v62 = vsub.f32 %v544_v44, %v580_v56 }
 0x21b   : > { %v571_v4 = vpop.xlane.xlu1 %570 }
 0x21c   : > { %v633_v5 = vadd.f32 %v632_v1, %v631_v61  ;;  %v623_v6 = vsel %vm615_vm15, %v588_v62, 0.0  ;;  %v581_v7 = vmul.f32 %v571_v4, %v516_v63 }
 0x21d   : > { %v636_v13 = vsel %vm626_vm11, %v623_v6, 0.0  ;;  %v550_v17 = vpop.xlane.xlu0 %549 }
 0x21e   : > { %v589_v10 = vsub.f32 %v547_v3, %v581_v7  ;;  %v635_v2 = vadd.f32 %v634_v8, %v633_v5 }
 0x21f   : > { %v574_v28 = vpop.xlane.xlu1 %573 }
 0x220   : > { %v624_v14 = vsel %vm616_vm0, %v589_v10, 0.0  ;;  %v582_v15 = vmul.f32 %v574_v28, %v518_v11  ;;  %v637_v16 = vadd.f32 %v636_v13, %v635_v2 }
 0x221   : > { %v638_v18 = vsel %vm626_vm11, %v624_v14, 0.0 }
 0x222   : > { %v590_v19 = vsub.f32 %v550_v17, %v582_v15  ;;  %v639_v21 = vadd.f32 %v638_v18, %v637_v16 }
 0x224   : > { %v625_v20 = vsel %vm617_vm1, %v590_v19, 0.0 }
 0x225   : > { %v640_v12 = vsel %vm626_vm11, %v625_v20, 0.0 }
 0x226   : > { %v641_v22 = vadd.f32 %v640_v12, %v639_v21 }
 0x228   : > { %642 = vadd.xlane.f32.xlu1 %v641_v22 }
 0x2b5   : > { %v643_v23 = vpop.xlane.xlu1 %642 }
 0x2b6   : > { %v644_v24 = vrot.slane %v643_v23, 4 }
 0x2b8   : > { %v645_v25 = vadd.f32 %v644_v24, %v643_v23 }
 0x2ba   : > { %v646_v26 = vrot.slane %v645_v25, 2 }
 0x2bc   : > { %v647_v27 = vadd.f32 %v646_v26, %v645_v25 }
 0x2be   : > { %v648_v29 = vrot.slane %v647_v27, 1 }
 0x2c0   : > { %v649_v30 = vadd.f32 %v648_v29, %v647_v27 }
 0x2c2   : > { %800 = vpush %v649_v30 }
 0x2f3   : > { %s801_s24 = spop %800 }
 0x2f4   : > { %v651_v31 = vstv %s801_s24 }
 0x2f5   : > { %652 = vst [vmem:[%s204_s17] sm:$0xff] %v651_v31 }
 0x2f6   : > { %890 = shalt.err (!%p887_p3)
}
 0x2f7   : > { %s891_s5 = scalar_lea.hbm %s1152_s27, 128  ;;  %s895_s8 = scalar_lea.hbm %s1195_s3, 512 }
 0x2f8   : > { %p892_p4 = scmp.ne.s32.totalorder %s1152_s27, %s891_s5  ;;  %p896_p9 = scmp.lt.u32.totalorder %s1152_s27, %s1195_s3 }
 0x2f9   : > { %p897_p10 = scmp.lt.u32.totalorder %s895_s8, %s891_s5  ;;  %p899_p12 = scmp.lt.u32.totalorder %s891_s5, %s1152_s27 }
 0x2fa   : > { %p893_p7 = pnand %p892_p4, %p1002_p5 }
 0x2fb   : > { %p898_p11 = por %p897_p10, %p896_p9 }
 0x2fc   : > { %p894_p8 = pneg %p893_p7 }
 0x2fd   : > { %p900_p13 = por %p899_p12, %p898_p11 }
 0x2ff   : > { %p901_p0 = pnand %p900_p13, %p894_p8 }
 0x301   : > { %904 = shalt.err (!%p901_p0)
}
 0x302   : > { %802 = dma.vmem_to_hbm [thread:$0]  (%p1002_p5), %s1147_s19, 128, %s1152_s27, %s654_s28  }
 0x303 PF: > { %p808_p1 = scmp.ge.s32.totalorder %s939_s15, 2  ;;  %s679_s11 = sand.u32 1, %s927_s12  }
 0x304   : > { %s680_s17 = scalar_lea.sflag [#allocation3], %s679_s11 }
 0x305   : > { %p805_p2 = pnand %p808_p1, %p1006_p6 }
 0x307   : > { %922 = dma.done.wait (!%p805_p2), %s680_s17, 128  }
 0x308   : > { %924 = vsyncadd (!%p805_p2), %s680_s17, 4294967168  ;;  %p13_p3 = scmp.ge.s32.totalorder %s989_s18, 6   ;;  %s1198_s12 = smov %s931_s13 }
 0x309   : > { %s1199_s13 = smov %s935_s14  ;;  %s1200_s14 = smov %s1000_s21 }
 0x30a   : > { %s1201_s15 = smov %s989_s18  ;;  %15 = sbr.rel (!%p13_p3) target bundleno = 3 (0x3), region = 70 }
 0x311   :  { %685 = vsyncpa [#allocation3], 1 }
 0x312   :  { %687 = vsyncpa [#allocation3 + $0x1], 1 }

</bundles_post_ra>
